<compile_context>
chip_gen: v7x
topology: tpu7x:2x2x1
jax: 0.10.0
libtpu: 0.0.40
codegen_flags: <defaults>
</compile_context>

<pallas_src>
import jax
import jax.numpy as jnp
from jax.experimental import pallas as pl
from jax.experimental.pallas import tpu as pltpu


# ----------------------------------------------------------------------------
# Pallas kernel: full ConditionalDoubleVectorCouplingBlock forward pass.
# ----------------------------------------------------------------------------
def make_coupling_kernel(depth, neg_slope=0.01):
    def kernel(x0_ref, x1_ref, xc_ref,
               w0x_ref, w0c_ref, b0_ref,
               wmid_ref, bmid_ref,
               wso_ref, bso_ref, wto_ref, bto_ref,
               y0_ref, y1_ref, ld_ref):
        x0 = x0_ref[...]                    # (B, half)
        x1 = x1_ref[...]                    # (B, half)
        xc = xc_ref[...]                    # (B, E)

        def lrelu(z):
            return jnp.where(z >= 0, z, neg_slope * z)

        def s_and_t(i, xin):
            # Merged s/t net of coupling step i: hidden width 2H,
            # lanes [:H] carry the s-net, lanes [H:] carry the t-net
            # (block-diagonal mid weights keep them independent).
            z = (jnp.dot(xin, w0x_ref[i], preferred_element_type=jnp.float32)
                 + jnp.dot(xc, w0c_ref[i], preferred_element_type=jnp.float32)
                 + b0_ref[i])
            z = lrelu(z)
            for d in range(depth):
                z = lrelu(jnp.dot(z, wmid_ref[i, d],
                                  preferred_element_type=jnp.float32)
                          + bmid_ref[i, d])
            s = jnp.tanh(jnp.dot(z, wso_ref[i],
                                 preferred_element_type=jnp.float32)
                         + bso_ref[i])
            t = (jnp.dot(z, wto_ref[i], preferred_element_type=jnp.float32)
                 + bto_ref[i])
            return s, t

        # --- coupling step 0: conditioner = cat(x0, xc); x1 <- x1*e^s + t ----
        s, t = s_and_t(0, x0)
        x1 = x1 * jnp.exp(s) + t
        logdet = jnp.sum(s, axis=1, keepdims=True)

        # --- coupling step 1: halves swapped; conditioner = cat(x1, xc) ------
        s, t = s_and_t(1, x1)
        x0 = x0 * jnp.exp(s) + t
        logdet = logdet + jnp.sum(s, axis=1, keepdims=True)

        # final flow state is cat(x1_new, x0_new); store the two aligned halves
        y0_ref[...] = x1
        y1_ref[...] = x0
        ld_ref[...] = logdet

    return kernel


def coupling_block_forward(x, xc, packed, depth):
    """x: (B, C, 1, 1), xc: (B, E, 1, 1) -> (x_out (B, C), logdet (B,))."""
    B, C = x.shape[0], x.shape[1]
    E = xc.shape[1]
    half = C // 2
    xf = x.reshape(B, C).astype(jnp.float32)
    xcf = xc.reshape(B, E).astype(jnp.float32)
    x0 = xf[:, :half]
    x1 = xf[:, half:]

    vmem = pl.BlockSpec(memory_space=pltpu.MemorySpace.VMEM)
    kernel = make_coupling_kernel(depth)
    y0, y1, ld = pl.pallas_call(
        kernel,
        out_shape=(jax.ShapeDtypeStruct((B, half), jnp.float32),
                   jax.ShapeDtypeStruct((B, half), jnp.float32),
                   jax.ShapeDtypeStruct((B, 1), jnp.float32)),
        in_specs=[vmem] * 12,
        out_specs=(vmem, vmem, vmem),
    )(x0, x1, xcf,
      packed['w0x'], packed['w0c'], packed['b0'],
      packed['wmid'], packed['bmid'],
      packed['wso'], packed['bso'], packed['wto'], packed['bto'])

    out = jnp.concatenate([y0, y1], axis=1)
    return out, ld[:, 0]


# ----------------------------------------------------------------------------
# Deterministic parameter init (PyTorch layer shapes) + host-side packing
# ----------------------------------------------------------------------------
def init_raw_params(key, C, E, H, depth):
    half = C // 2
    din = half + E

    def init_net(k):
        k1, k2, k3, k4, k5, k6 = jax.random.split(k, 6)
        return dict(
            w1=0.2 * jax.random.normal(k1, (din, H), jnp.float32),
            b1=0.1 * jax.random.normal(k2, (H,), jnp.float32),
            wm=0.2 * jax.random.normal(k3, (depth, H, H), jnp.float32),
            bm=0.1 * jax.random.normal(k4, (depth, H), jnp.float32),
            wo=0.2 * jax.random.normal(k5, (H, half), jnp.float32),
            bo=0.1 * jax.random.normal(k6, (half,), jnp.float32),
        )

    ks, kt = jax.random.split(key)
    ks = jax.random.split(ks, 2)
    kt = jax.random.split(kt, 2)
    return dict(s=[init_net(ks[0]), init_net(ks[1])],
                t=[init_net(kt[0]), init_net(kt[1])])


def pack_params(raw, C, E, H, depth):
    """Merge each coupling step's s-net and t-net into one 2H-wide net
    (block-diagonal mid layers); stack the two steps along a leading axis."""
    half = C // 2
    zeros_hh = jnp.zeros((H, H), jnp.float32)
    zeros_ho = jnp.zeros((H, half), jnp.float32)
    w0x, w0c, b0, wmid, bmid = [], [], [], [], []
    wso, bso, wto, bto = [], [], [], []
    for i in range(2):
        s, t = raw['s'][i], raw['t'][i]
        w0x.append(jnp.concatenate([s['w1'][:half], t['w1'][:half]], axis=1))
        w0c.append(jnp.concatenate([s['w1'][half:], t['w1'][half:]], axis=1))
        b0.append(jnp.concatenate([s['b1'], t['b1']])[None, :])
        wm_i, bm_i = [], []
        for d in range(depth):
            top = jnp.concatenate([s['wm'][d], zeros_hh], axis=1)
            bot = jnp.concatenate([zeros_hh, t['wm'][d]], axis=1)
            wm_i.append(jnp.concatenate([top, bot], axis=0))
            bm_i.append(jnp.concatenate([s['bm'][d], t['bm'][d]])[None, :])
        wmid.append(jnp.stack(wm_i))
        bmid.append(jnp.stack(bm_i))
        wso.append(jnp.concatenate([s['wo'], zeros_ho], axis=0))
        bso.append(s['bo'][None, :])
        wto.append(jnp.concatenate([zeros_ho, t['wo']], axis=0))
        bto.append(t['bo'][None, :])
    return dict(w0x=jnp.stack(w0x), w0c=jnp.stack(w0c), b0=jnp.stack(b0),
                wmid=jnp.stack(wmid), bmid=jnp.stack(bmid),
                wso=jnp.stack(wso), bso=jnp.stack(bso),
                wto=jnp.stack(wto), bto=jnp.stack(bto))


# ----------------------------------------------------------------------------
# Pure-JAX reference (mirrors the PyTorch module layer-by-layer, unmerged)
# ----------------------------------------------------------------------------
def _ref_net(net, x, use_tanh, depth, neg_slope=0.01):
    z = x @ net['w1'] + net['b1']
    z = jnp.where(z >= 0, z, neg_slope * z)
    for d in range(depth):
        z = z @ net['wm'][d] + net['bm'][d]
        z = jnp.where(z >= 0, z, neg_slope * z)
    z = z @ net['wo'] + net['bo']
    return jnp.tanh(z) if use_tanh else z


def ref_forward(x, xc, raw, depth):
    B, C = x.shape[0], x.shape[1]
    half = C // 2
    x2 = x.reshape(B, C)
    xc2 = xc.reshape(B, xc.shape[1])
    logdet = jnp.zeros((B,), jnp.float32)
    for i in range(2):
        if i % 2 != 0:
            x2 = jnp.concatenate([x2[:, half:], x2[:, :half]], axis=1)
        xa, xk = x2[:, :half], x2[:, half:]
        cond = jnp.concatenate([xa, xc2], axis=1)
        s = _ref_net(raw['s'][i], cond, True, depth)
        t = _ref_net(raw['t'][i], cond, False, depth)
        xk = xk * jnp.exp(s) + t
        x2 = jnp.concatenate([xa, xk], axis=1)
        logdet = logdet + jnp.sum(s, axis=1)
    return x2, logdet


if __name__ == "__main__":
    # ConditionalDoubleVectorCouplingBlock(in_channels=16, cond_channels=8,
    #                                      hidden_dim=32, depth=2)
    B, C, E, H, depth = 2, 16, 8, 32, 2

    key = jax.random.PRNGKey(0)
    kx, kc, kp = jax.random.split(key, 3)
    x = jax.random.normal(kx, (B, C, 1, 1), jnp.float32)
    xc = jax.random.normal(kc, (B, E, 1, 1), jnp.float32)
    raw = init_raw_params(kp, C, E, H, depth)
    packed = pack_params(raw, C, E, H, depth)

    out, logdet = coupling_block_forward(x, xc, packed, depth)
    out = jax.block_until_ready(out)
    logdet = jax.block_until_ready(logdet)

    out_ref, logdet_ref = ref_forward(x, xc, raw, depth)
    assert out.shape == (B, C) and logdet.shape == (B,)
    assert jnp.allclose(out, out_ref, atol=1e-4, rtol=1e-4)
    assert jnp.allclose(logdet, logdet_ref, atol=1e-4, rtol=1e-4)

    print("KERNEL_OK")
</pallas_src>

<mosaic_0001>
module attributes {stable_mosaic.version = 11 : i64} {
  func.func @kernel(%arg0: memref<2x8xf32, #tpu.memory_space<vmem>>, %arg1: memref<2x8xf32, #tpu.memory_space<vmem>>, %arg2: memref<2x8xf32, #tpu.memory_space<vmem>>, %arg3: memref<2x8x64xf32, #tpu.memory_space<vmem>>, %arg4: memref<2x8x64xf32, #tpu.memory_space<vmem>>, %arg5: memref<2x1x64xf32, #tpu.memory_space<vmem>>, %arg6: memref<2x2x64x64xf32, #tpu.memory_space<vmem>>, %arg7: memref<2x2x1x64xf32, #tpu.memory_space<vmem>>, %arg8: memref<2x64x8xf32, #tpu.memory_space<vmem>>, %arg9: memref<2x1x8xf32, #tpu.memory_space<vmem>>, %arg10: memref<2x64x8xf32, #tpu.memory_space<vmem>>, %arg11: memref<2x1x8xf32, #tpu.memory_space<vmem>>, %arg12: memref<2x8xf32, #tpu.memory_space<vmem>>, %arg13: memref<2x8xf32, #tpu.memory_space<vmem>>, %arg14: memref<2x1xf32, #tpu.memory_space<vmem>>) attributes {dimension_semantics = [], scalar_prefetch = 0 : i64, scratch_operands = 0 : i64, tpu.core_type = #tpu.core_type<tc>} {
    %c0 = arith.constant 0 : index
    %c0_0 = arith.constant 0 : index
    %0 = vector.load %arg0[%c0, %c0_0] : memref<2x8xf32, #tpu.memory_space<vmem>>, vector<2x8xf32>
    %c0_1 = arith.constant 0 : index
    %c0_2 = arith.constant 0 : index
    %1 = vector.load %arg1[%c0_1, %c0_2] : memref<2x8xf32, #tpu.memory_space<vmem>>, vector<2x8xf32>
    %c0_3 = arith.constant 0 : index
    %c0_4 = arith.constant 0 : index
    %2 = vector.load %arg2[%c0_3, %c0_4] : memref<2x8xf32, #tpu.memory_space<vmem>>, vector<2x8xf32>
    %c0_5 = arith.constant 0 : index
    %c0_6 = arith.constant 0 : index
    %c0_7 = arith.constant 0 : index
    %3 = vector.load %arg3[%c0_5, %c0_6, %c0_7] : memref<2x8x64xf32, #tpu.memory_space<vmem>>, vector<1x8x64xf32>
    %4 = vector.shape_cast %3 : vector<1x8x64xf32> to vector<8x64xf32>
    %cst = arith.constant dense<0.000000e+00> : vector<2x64xf32>
    %5 = tpu.matmul %0, %4, %cst {dimension_numbers = #tpu.dot_dimension_numbers<[1], [0], [0], [1], [0, 0, 1, 1], [], []>} : vector<2x8xf32>, vector<8x64xf32>, vector<2x64xf32> -> vector<2x64xf32>
    %c0_8 = arith.constant 0 : index
    %c0_9 = arith.constant 0 : index
    %c0_10 = arith.constant 0 : index
    %6 = vector.load %arg4[%c0_8, %c0_9, %c0_10] : memref<2x8x64xf32, #tpu.memory_space<vmem>>, vector<1x8x64xf32>
    %7 = vector.shape_cast %6 : vector<1x8x64xf32> to vector<8x64xf32>
    %cst_11 = arith.constant dense<0.000000e+00> : vector<2x64xf32>
    %8 = tpu.matmul %2, %7, %cst_11 {dimension_numbers = #tpu.dot_dimension_numbers<[1], [0], [0], [1], [0, 0, 1, 1], [], []>} : vector<2x8xf32>, vector<8x64xf32>, vector<2x64xf32> -> vector<2x64xf32>
    %9 = arith.addf %5, %8 : vector<2x64xf32>
    %c0_12 = arith.constant 0 : index
    %c0_13 = arith.constant 0 : index
    %c0_14 = arith.constant 0 : index
    %10 = vector.load %arg5[%c0_12, %c0_13, %c0_14] : memref<2x1x64xf32, #tpu.memory_space<vmem>>, vector<1x1x64xf32>
    %11 = vector.shape_cast %10 : vector<1x1x64xf32> to vector<1x64xf32>
    %12 = vector.broadcast %11 : vector<1x64xf32> to vector<2x64xf32>
    %13 = arith.addf %9, %12 : vector<2x64xf32>
    %cst_15 = arith.constant 0.000000e+00 : f32
    %14 = vector.broadcast %cst_15 : f32 to vector<2x64xf32>
    %15 = arith.cmpf oge, %13, %14 : vector<2x64xf32>
    %cst_16 = arith.constant 0.00999999977 : f32
    %16 = vector.broadcast %cst_16 : f32 to vector<2x64xf32>
    %17 = arith.mulf %16, %13 : vector<2x64xf32>
    %18 = arith.select %15, %13, %17 : vector<2x64xi1>, vector<2x64xf32>
    %c0_17 = arith.constant 0 : index
    %c0_18 = arith.constant 0 : index
    %c0_19 = arith.constant 0 : index
    %c0_20 = arith.constant 0 : index
    %19 = vector.load %arg6[%c0_17, %c0_18, %c0_19, %c0_20] : memref<2x2x64x64xf32, #tpu.memory_space<vmem>>, vector<1x1x64x64xf32>
    %20 = vector.shape_cast %19 : vector<1x1x64x64xf32> to vector<64x64xf32>
    %cst_21 = arith.constant dense<0.000000e+00> : vector<2x64xf32>
    %21 = tpu.matmul %18, %20, %cst_21 {dimension_numbers = #tpu.dot_dimension_numbers<[1], [0], [0], [1], [0, 0, 1, 1], [], []>} : vector<2x64xf32>, vector<64x64xf32>, vector<2x64xf32> -> vector<2x64xf32>
    %c0_22 = arith.constant 0 : index
    %c0_23 = arith.constant 0 : index
    %c0_24 = arith.constant 0 : index
    %c0_25 = arith.constant 0 : index
    %22 = vector.load %arg7[%c0_22, %c0_23, %c0_24, %c0_25] : memref<2x2x1x64xf32, #tpu.memory_space<vmem>>, vector<1x1x1x64xf32>
    %23 = vector.shape_cast %22 : vector<1x1x1x64xf32> to vector<1x64xf32>
    %24 = vector.broadcast %23 : vector<1x64xf32> to vector<2x64xf32>
    %25 = arith.addf %21, %24 : vector<2x64xf32>
    %cst_26 = arith.constant 0.000000e+00 : f32
    %26 = vector.broadcast %cst_26 : f32 to vector<2x64xf32>
    %27 = arith.cmpf oge, %25, %26 : vector<2x64xf32>
    %cst_27 = arith.constant 0.00999999977 : f32
    %28 = vector.broadcast %cst_27 : f32 to vector<2x64xf32>
    %29 = arith.mulf %28, %25 : vector<2x64xf32>
    %30 = arith.select %27, %25, %29 : vector<2x64xi1>, vector<2x64xf32>
    %c0_28 = arith.constant 0 : index
    %c1 = arith.constant 1 : index
    %c0_29 = arith.constant 0 : index
    %c0_30 = arith.constant 0 : index
    %31 = vector.load %arg6[%c0_28, %c1, %c0_29, %c0_30] : memref<2x2x64x64xf32, #tpu.memory_space<vmem>>, vector<1x1x64x64xf32>
    %32 = vector.shape_cast %31 : vector<1x1x64x64xf32> to vector<64x64xf32>
    %cst_31 = arith.constant dense<0.000000e+00> : vector<2x64xf32>
    %33 = tpu.matmul %30, %32, %cst_31 {dimension_numbers = #tpu.dot_dimension_numbers<[1], [0], [0], [1], [0, 0, 1, 1], [], []>} : vector<2x64xf32>, vector<64x64xf32>, vector<2x64xf32> -> vector<2x64xf32>
    %c0_32 = arith.constant 0 : index
    %c1_33 = arith.constant 1 : index
    %c0_34 = arith.constant 0 : index
    %c0_35 = arith.constant 0 : index
    %34 = vector.load %arg7[%c0_32, %c1_33, %c0_34, %c0_35] : memref<2x2x1x64xf32, #tpu.memory_space<vmem>>, vector<1x1x1x64xf32>
    %35 = vector.shape_cast %34 : vector<1x1x1x64xf32> to vector<1x64xf32>
    %36 = vector.broadcast %35 : vector<1x64xf32> to vector<2x64xf32>
    %37 = arith.addf %33, %36 : vector<2x64xf32>
    %cst_36 = arith.constant 0.000000e+00 : f32
    %38 = vector.broadcast %cst_36 : f32 to vector<2x64xf32>
    %39 = arith.cmpf oge, %37, %38 : vector<2x64xf32>
    %cst_37 = arith.constant 0.00999999977 : f32
    %40 = vector.broadcast %cst_37 : f32 to vector<2x64xf32>
    %41 = arith.mulf %40, %37 : vector<2x64xf32>
    %42 = arith.select %39, %37, %41 : vector<2x64xi1>, vector<2x64xf32>
    %c0_38 = arith.constant 0 : index
    %c0_39 = arith.constant 0 : index
    %c0_40 = arith.constant 0 : index
    %43 = vector.load %arg8[%c0_38, %c0_39, %c0_40] : memref<2x64x8xf32, #tpu.memory_space<vmem>>, vector<1x64x8xf32>
    %44 = vector.shape_cast %43 : vector<1x64x8xf32> to vector<64x8xf32>
    %cst_41 = arith.constant dense<0.000000e+00> : vector<2x8xf32>
    %45 = tpu.matmul %42, %44, %cst_41 {dimension_numbers = #tpu.dot_dimension_numbers<[1], [0], [0], [1], [0, 0, 1, 1], [], []>} : vector<2x64xf32>, vector<64x8xf32>, vector<2x8xf32> -> vector<2x8xf32>
    %c0_42 = arith.constant 0 : index
    %c0_43 = arith.constant 0 : index
    %c0_44 = arith.constant 0 : index
    %46 = vector.load %arg9[%c0_42, %c0_43, %c0_44] : memref<2x1x8xf32, #tpu.memory_space<vmem>>, vector<1x1x8xf32>
    %47 = vector.shape_cast %46 : vector<1x1x8xf32> to vector<1x8xf32>
    %48 = vector.broadcast %47 : vector<1x8xf32> to vector<2x8xf32>
    %49 = arith.addf %45, %48 : vector<2x8xf32>
    %50 = math.tanh %49 : vector<2x8xf32>
    %c0_45 = arith.constant 0 : index
    %c0_46 = arith.constant 0 : index
    %c0_47 = arith.constant 0 : index
    %51 = vector.load %arg10[%c0_45, %c0_46, %c0_47] : memref<2x64x8xf32, #tpu.memory_space<vmem>>, vector<1x64x8xf32>
    %52 = vector.shape_cast %51 : vector<1x64x8xf32> to vector<64x8xf32>
    %cst_48 = arith.constant dense<0.000000e+00> : vector<2x8xf32>
    %53 = tpu.matmul %42, %52, %cst_48 {dimension_numbers = #tpu.dot_dimension_numbers<[1], [0], [0], [1], [0, 0, 1, 1], [], []>} : vector<2x64xf32>, vector<64x8xf32>, vector<2x8xf32> -> vector<2x8xf32>
    %c0_49 = arith.constant 0 : index
    %c0_50 = arith.constant 0 : index
    %c0_51 = arith.constant 0 : index
    %54 = vector.load %arg11[%c0_49, %c0_50, %c0_51] : memref<2x1x8xf32, #tpu.memory_space<vmem>>, vector<1x1x8xf32>
    %55 = vector.shape_cast %54 : vector<1x1x8xf32> to vector<1x8xf32>
    %56 = vector.broadcast %55 : vector<1x8xf32> to vector<2x8xf32>
    %57 = arith.addf %53, %56 : vector<2x8xf32>
    %58 = math.exp %50 : vector<2x8xf32>
    %59 = arith.mulf %1, %58 : vector<2x8xf32>
    %60 = arith.addf %59, %57 : vector<2x8xf32>
    %cst_52 = arith.constant dense<0.000000e+00> : vector<2xf32>
    %61 = vector.multi_reduction <add>, %50, %cst_52 [1] : vector<2x8xf32> to vector<2xf32>
    %62 = vector.shape_cast %61 : vector<2xf32> to vector<2x1xf32>
    %c1_53 = arith.constant 1 : index
    %c0_54 = arith.constant 0 : index
    %c0_55 = arith.constant 0 : index
    %63 = vector.load %arg3[%c1_53, %c0_54, %c0_55] : memref<2x8x64xf32, #tpu.memory_space<vmem>>, vector<1x8x64xf32>
    %64 = vector.shape_cast %63 : vector<1x8x64xf32> to vector<8x64xf32>
    %cst_56 = arith.constant dense<0.000000e+00> : vector<2x64xf32>
    %65 = tpu.matmul %60, %64, %cst_56 {dimension_numbers = #tpu.dot_dimension_numbers<[1], [0], [0], [1], [0, 0, 1, 1], [], []>} : vector<2x8xf32>, vector<8x64xf32>, vector<2x64xf32> -> vector<2x64xf32>
    %c1_57 = arith.constant 1 : index
    %c0_58 = arith.constant 0 : index
    %c0_59 = arith.constant 0 : index
    %66 = vector.load %arg4[%c1_57, %c0_58, %c0_59] : memref<2x8x64xf32, #tpu.memory_space<vmem>>, vector<1x8x64xf32>
    %67 = vector.shape_cast %66 : vector<1x8x64xf32> to vector<8x64xf32>
    %cst_60 = arith.constant dense<0.000000e+00> : vector<2x64xf32>
    %68 = tpu.matmul %2, %67, %cst_60 {dimension_numbers = #tpu.dot_dimension_numbers<[1], [0], [0], [1], [0, 0, 1, 1], [], []>} : vector<2x8xf32>, vector<8x64xf32>, vector<2x64xf32> -> vector<2x64xf32>
    %69 = arith.addf %65, %68 : vector<2x64xf32>
    %c1_61 = arith.constant 1 : index
    %c0_62 = arith.constant 0 : index
    %c0_63 = arith.constant 0 : index
    %70 = vector.load %arg5[%c1_61, %c0_62, %c0_63] : memref<2x1x64xf32, #tpu.memory_space<vmem>>, vector<1x1x64xf32>
    %71 = vector.shape_cast %70 : vector<1x1x64xf32> to vector<1x64xf32>
    %72 = vector.broadcast %71 : vector<1x64xf32> to vector<2x64xf32>
    %73 = arith.addf %69, %72 : vector<2x64xf32>
    %cst_64 = arith.constant 0.000000e+00 : f32
    %74 = vector.broadcast %cst_64 : f32 to vector<2x64xf32>
    %75 = arith.cmpf oge, %73, %74 : vector<2x64xf32>
    %cst_65 = arith.constant 0.00999999977 : f32
    %76 = vector.broadcast %cst_65 : f32 to vector<2x64xf32>
    %77 = arith.mulf %76, %73 : vector<2x64xf32>
    %78 = arith.select %75, %73, %77 : vector<2x64xi1>, vector<2x64xf32>
    %c1_66 = arith.constant 1 : index
    %c0_67 = arith.constant 0 : index
    %c0_68 = arith.constant 0 : index
    %c0_69 = arith.constant 0 : index
    %79 = vector.load %arg6[%c1_66, %c0_67, %c0_68, %c0_69] : memref<2x2x64x64xf32, #tpu.memory_space<vmem>>, vector<1x1x64x64xf32>
    %80 = vector.shape_cast %79 : vector<1x1x64x64xf32> to vector<64x64xf32>
    %cst_70 = arith.constant dense<0.000000e+00> : vector<2x64xf32>
    %81 = tpu.matmul %78, %80, %cst_70 {dimension_numbers = #tpu.dot_dimension_numbers<[1], [0], [0], [1], [0, 0, 1, 1], [], []>} : vector<2x64xf32>, vector<64x64xf32>, vector<2x64xf32> -> vector<2x64xf32>
    %c1_71 = arith.constant 1 : index
    %c0_72 = arith.constant 0 : index
    %c0_73 = arith.constant 0 : index
    %c0_74 = arith.constant 0 : index
    %82 = vector.load %arg7[%c1_71, %c0_72, %c0_73, %c0_74] : memref<2x2x1x64xf32, #tpu.memory_space<vmem>>, vector<1x1x1x64xf32>
    %83 = vector.shape_cast %82 : vector<1x1x1x64xf32> to vector<1x64xf32>
    %84 = vector.broadcast %83 : vector<1x64xf32> to vector<2x64xf32>
    %85 = arith.addf %81, %84 : vector<2x64xf32>
    %cst_75 = arith.constant 0.000000e+00 : f32
    %86 = vector.broadcast %cst_75 : f32 to vector<2x64xf32>
    %87 = arith.cmpf oge, %85, %86 : vector<2x64xf32>
    %cst_76 = arith.constant 0.00999999977 : f32
    %88 = vector.broadcast %cst_76 : f32 to vector<2x64xf32>
    %89 = arith.mulf %88, %85 : vector<2x64xf32>
    %90 = arith.select %87, %85, %89 : vector<2x64xi1>, vector<2x64xf32>
    %c1_77 = arith.constant 1 : index
    %c1_78 = arith.constant 1 : index
    %c0_79 = arith.constant 0 : index
    %c0_80 = arith.constant 0 : index
    %91 = vector.load %arg6[%c1_77, %c1_78, %c0_79, %c0_80] : memref<2x2x64x64xf32, #tpu.memory_space<vmem>>, vector<1x1x64x64xf32>
    %92 = vector.shape_cast %91 : vector<1x1x64x64xf32> to vector<64x64xf32>
    %cst_81 = arith.constant dense<0.000000e+00> : vector<2x64xf32>
    %93 = tpu.matmul %90, %92, %cst_81 {dimension_numbers = #tpu.dot_dimension_numbers<[1], [0], [0], [1], [0, 0, 1, 1], [], []>} : vector<2x64xf32>, vector<64x64xf32>, vector<2x64xf32> -> vector<2x64xf32>
    %c1_82 = arith.constant 1 : index
    %c1_83 = arith.constant 1 : index
    %c0_84 = arith.constant 0 : index
    %c0_85 = arith.constant 0 : index
    %94 = vector.load %arg7[%c1_82, %c1_83, %c0_84, %c0_85] : memref<2x2x1x64xf32, #tpu.memory_space<vmem>>, vector<1x1x1x64xf32>
    %95 = vector.shape_cast %94 : vector<1x1x1x64xf32> to vector<1x64xf32>
    %96 = vector.broadcast %95 : vector<1x64xf32> to vector<2x64xf32>
    %97 = arith.addf %93, %96 : vector<2x64xf32>
    %cst_86 = arith.constant 0.000000e+00 : f32
    %98 = vector.broadcast %cst_86 : f32 to vector<2x64xf32>
    %99 = arith.cmpf oge, %97, %98 : vector<2x64xf32>
    %cst_87 = arith.constant 0.00999999977 : f32
    %100 = vector.broadcast %cst_87 : f32 to vector<2x64xf32>
    %101 = arith.mulf %100, %97 : vector<2x64xf32>
    %102 = arith.select %99, %97, %101 : vector<2x64xi1>, vector<2x64xf32>
    %c1_88 = arith.constant 1 : index
    %c0_89 = arith.constant 0 : index
    %c0_90 = arith.constant 0 : index
    %103 = vector.load %arg8[%c1_88, %c0_89, %c0_90] : memref<2x64x8xf32, #tpu.memory_space<vmem>>, vector<1x64x8xf32>
    %104 = vector.shape_cast %103 : vector<1x64x8xf32> to vector<64x8xf32>
    %cst_91 = arith.constant dense<0.000000e+00> : vector<2x8xf32>
    %105 = tpu.matmul %102, %104, %cst_91 {dimension_numbers = #tpu.dot_dimension_numbers<[1], [0], [0], [1], [0, 0, 1, 1], [], []>} : vector<2x64xf32>, vector<64x8xf32>, vector<2x8xf32> -> vector<2x8xf32>
    %c1_92 = arith.constant 1 : index
    %c0_93 = arith.constant 0 : index
    %c0_94 = arith.constant 0 : index
    %106 = vector.load %arg9[%c1_92, %c0_93, %c0_94] : memref<2x1x8xf32, #tpu.memory_space<vmem>>, vector<1x1x8xf32>
    %107 = vector.shape_cast %106 : vector<1x1x8xf32> to vector<1x8xf32>
    %108 = vector.broadcast %107 : vector<1x8xf32> to vector<2x8xf32>
    %109 = arith.addf %105, %108 : vector<2x8xf32>
    %110 = math.tanh %109 : vector<2x8xf32>
    %c1_95 = arith.constant 1 : index
    %c0_96 = arith.constant 0 : index
    %c0_97 = arith.constant 0 : index
    %111 = vector.load %arg10[%c1_95, %c0_96, %c0_97] : memref<2x64x8xf32, #tpu.memory_space<vmem>>, vector<1x64x8xf32>
    %112 = vector.shape_cast %111 : vector<1x64x8xf32> to vector<64x8xf32>
    %cst_98 = arith.constant dense<0.000000e+00> : vector<2x8xf32>
    %113 = tpu.matmul %102, %112, %cst_98 {dimension_numbers = #tpu.dot_dimension_numbers<[1], [0], [0], [1], [0, 0, 1, 1], [], []>} : vector<2x64xf32>, vector<64x8xf32>, vector<2x8xf32> -> vector<2x8xf32>
    %c1_99 = arith.constant 1 : index
    %c0_100 = arith.constant 0 : index
    %c0_101 = arith.constant 0 : index
    %114 = vector.load %arg11[%c1_99, %c0_100, %c0_101] : memref<2x1x8xf32, #tpu.memory_space<vmem>>, vector<1x1x8xf32>
    %115 = vector.shape_cast %114 : vector<1x1x8xf32> to vector<1x8xf32>
    %116 = vector.broadcast %115 : vector<1x8xf32> to vector<2x8xf32>
    %117 = arith.addf %113, %116 : vector<2x8xf32>
    %118 = math.exp %110 : vector<2x8xf32>
    %119 = arith.mulf %0, %118 : vector<2x8xf32>
    %120 = arith.addf %119, %117 : vector<2x8xf32>
    %cst_102 = arith.constant dense<0.000000e+00> : vector<2xf32>
    %121 = vector.multi_reduction <add>, %110, %cst_102 [1] : vector<2x8xf32> to vector<2xf32>
    %122 = vector.shape_cast %121 : vector<2xf32> to vector<2x1xf32>
    %123 = arith.addf %62, %122 : vector<2x1xf32>
    %c0_103 = arith.constant 0 : index
    %c0_104 = arith.constant 0 : index
    %124 = vector.load %arg12[%c0_103, %c0_104] : memref<2x8xf32, #tpu.memory_space<vmem>>, vector<2x8xf32>
    tpu.vector_store %arg12[%c0_103, %c0_104], %60 {strides = array<i32>} : memref<2x8xf32, #tpu.memory_space<vmem>>, vector<2x8xf32>,
    %c0_105 = arith.constant 0 : index
    %c0_106 = arith.constant 0 : index
    %125 = vector.load %arg13[%c0_105, %c0_106] : memref<2x8xf32, #tpu.memory_space<vmem>>, vector<2x8xf32>
    tpu.vector_store %arg13[%c0_105, %c0_106], %120 {strides = array<i32>} : memref<2x8xf32, #tpu.memory_space<vmem>>, vector<2x8xf32>,
    %c0_107 = arith.constant 0 : index
    %c0_108 = arith.constant 0 : index
    %126 = vector.load %arg14[%c0_107, %c0_108] : memref<2x1xf32, #tpu.memory_space<vmem>>, vector<2x1xf32>
    tpu.vector_store %arg14[%c0_107, %c0_108], %123 {strides = array<i32>} : memref<2x1xf32, #tpu.memory_space<vmem>>, vector<2x1xf32>,
    return
  }
}

</mosaic_0001>

<bundles_post_ra>
// kernel: tpu_custom_call.1
= control target key start
LH: loop header
LB: loop body
LE: loop exit
PB: predicated region body
PF: predicated region fallthrough
CT: control target
= control target key end

     0   :  { %20 = vsyncpa [#allocation3], 0  ;;  %s2106_s0 = inlined_call_operand.vmem [shape: f32[2,8], index: 0, kind: input, shape index: {}]   ;;  %s2107_s1 = inlined_call_operand.vmem [shape: f32[2,8], index: 1, kind: input, shape index: {}]   ;;  %s2108_s2 = inlined_call_operand.vmem [shape: f32[2,8], index: 2, kind: input, shape index: {}]   ;;  %s2109_s3 = inlined_call_operand.vmem [shape: f32[2,8,64], index: 3, kind: input, shape index: {}]   ;;  %s2110_s4 = inlined_call_operand.hbm [shape: f32[2,8,64], index: 4, kind: input, shape index: {}]   ;;  %s2111_s5 = inlined_call_operand.vmem [shape: f32[2,1,64], index: 5, kind: input, shape index: {}]   ;;  %s2112_s6 = inlined_call_operand.vmem [shape: f32[2,2,64,64], index: 6, kind: input, shape index: {}]   ;;  %s2113_s7 = inlined_call_operand.vmem [shape: f32[2,2,1,64], index: 7, kind: input, shape index: {}]   ;;  %s2114_s8 = inlined_call_operand.vmem [shape: f32[2,64,8], index: 8, kind: input, shape index: {}]   ;;  %s2115_s9 = inlined_call_operand.vmem [shape: f32[2,1,8], index: 9, kind: input, shape index: {}]   ;;  %s2116_s10 = inlined_call_operand.vmem [shape: f32[2,64,8], index: 10, kind: input, shape index: {}]   ;;  %s2117_s11 = inlined_call_operand.vmem [shape: f32[2,1,8], index: 11, kind: input, shape index: {}]   ;;  %s2118_s12 = inlined_call_operand.hbm [shape: f32[2,8], index: 12, kind: output, shape index: {0}]   ;;  %s2119_s13 = inlined_call_operand.hbm [shape: f32[2,8], index: 13, kind: output, shape index: {1}]   ;;  %s2120_s14 = inlined_call_operand.vmem [shape: f32[2,1], index: 14, kind: output, shape index: {2}]  }
   0x1   :  { %21 = vsyncpa [#allocation4], 0 }
   0x2   :  { %22 = vsyncpa [#allocation7], 0  ;;  %s1663_s29 = smov [#allocation2]   ;;  %s1591_s17 = scalar_lea.hbm %s2110_s4, 256 }
   0x3   :  { %s36_s30 = sshll.u32 %s1663_s29, 4  ;;  %p1592_p0 = scmp.ne.s32.totalorder %s2110_s4, %s1591_s17  ;;  %s37_s30 = int_to_ptr.vmem [resolvable:$true] %s36_s30 }
   0x4   :  { %p1595_p1 = scmp.lt.u32.totalorder %s1591_s17, %s2110_s4 }
   0x6   :  { %p1597_p2 = pnand %p1595_p1, %p1592_p0 }
   0x8   :  { %1600 = shalt.err (!%p1597_p2)
}
   0x9   :  { %s1601_s22 = scalar_lea.vmem %s37_s30, 256  ;;  %p1606_p4 = scmp.lt.s32.totalorder %s37_s30, %s37_s30 }
   0xa   :  { %p1602_p3 = scmp.ne.s32.totalorder %s37_s30, %s1601_s22  ;;  %p1607_p5 = scmp.lt.s32.totalorder %s1601_s22, %s1601_s22 }
   0xc   :  { %p1608_p6 = por %p1607_p5, %p1606_p4 }
   0xe   :  { %p1609_p7 = pnand %p1608_p6, %p1602_p3 }
  0x10   :  { %1612 = shalt.err (!%p1609_p7)
}
  0x11   :  { %s1664_s23 = smov 128   ;;  %s1665_s24 = smov 8  }
  0x12   :  { %42 = dma.hbm_to_vmem [thread:$0]  %s2110_s4, 256, %s37_s30, [#allocation3], %s1664_s23, %s1664_s23, %s1665_s24  }
  0x13   :  { %1657 = dma.done.wait [#allocation3], 256  }
  0x14   :  { %1658 = vsyncadd [#allocation3], 4294967040  ;;  %v1666_v0 = vmov 0.0   ;;  %vm1667_vm0 = vmmov 0   ;;  %vm65_vm1 = vcmask 64512   ;;  %v64_v1 = vld [vmem:[#allocation2] sm:$0xff] }
  0x15   :  { %1307 = vmatprep.subr.mxu0 %v1666_v0  ;;  %1312 = vmatprep.subr.mxu1 %v1666_v0  ;;  %v63_v2 = vld [vmem:[%s2109_s3] sm:$0xff]  ;;  %v224_v6 = vld [vmem:[%s2112_s6 + $0x8] sm:$0xff]  ;;  %v225_v8 = vld [vmem:[%s2112_s6 + $0x10] sm:$0xff]  ;;  %v1668_v10 = vmov 0.0|0.0   ;;  %vm238_vm3 = vcmask 523264   ;;  %vm586_vm6 = vcmask 58368  }
  0x16   :  { %1309 = vmatprep.mubr.msk.f32.mxu0 %vm1667_vm0, %v1666_v0  ;;  %1314 = vmatprep.mubr.msk.f32.mxu1 %vm1667_vm0, %v1666_v0  ;;  %v1770_v3 = vld [vmem:[%s2108_s2] sm:$0x3]  ;;  %v226_v9 = vld [vmem:[%s2112_s6 + $0x18] sm:$0xff]  ;;  %v228_v13 = vld [vmem:[%s2112_s6 + $0x28] sm:$0xff] }
  0x17   :  { %1308 = vmatpush3.msra.mxu0 %v64_v1  ;;  %1313 = vmatpush3.msra.mxu1 %v63_v2  ;;  %v1775_v4 = vld [vmem:[%s2106_s0] sm:$0x3]  ;;  %v1483_v11 = vpack.c.bf16 %v226_v9, %v225_v8  ;;  %v229_v15 = vld [vmem:[%s2112_s6 + $0x30] sm:$0xff]  ;;  %v230_v16 = vld [vmem:[%s2112_s6 + $0x38] sm:$0xff]  ;;  %s1670_s0 = smov [#allocation6]  }
  0x18   :  { %v223_v5 = vld [vmem:[%s2112_s6] sm:$0xff]  ;;  %1310 = vmatmul.mubr.msk.f32.vlgmr.msra.gmra.mrb[0].mxu0 %vm65_vm1, %v1770_v3  ;;  %1315 = vmatmul.mubr.msk.f32.vlgmr.msra.gmra.mrb[0].mxu1 %vm65_vm1, %v1775_v4  ;;  %v1489_v17 = vpack.c.bf16 %v230_v16, %v229_v15  ;;  %v1164_v19 = vld [vmem:[%s2112_s6 + $0x48] sm:$0xff]  ;;  %v1165_v20 = vld [vmem:[%s2112_s6 + $0x50] sm:$0xff] }
  0x19   :  { %v1480_v7 = vpack.c.bf16 %v224_v6, %v223_v5  ;;  %1479 = vmatprep.subr.bf16.mxu0 %v1668_v10  ;;  %1333 = vmatprep.mubr.msk.f32.mxu0 %vm1667_vm0, %v1666_v0  ;;  %v227_v12 = vld [vmem:[%s2112_s6 + $0x20] sm:$0xff]  ;;  %v1166_v22 = vld [vmem:[%s2112_s6 + $0x58] sm:$0xff]  ;;  %v1168_v25 = vld [vmem:[%s2112_s6 + $0x68] sm:$0xff] }
  0x1a   :  { %1491 = vmatprep.subr.bf16.mxu1 %v1668_v10  ;;  %1352 = vmatprep.mubr.msk.f32.mxu1 %vm1667_vm0, %v1666_v0  ;;  %v1486_v14 = vpack.c.bf16 %v228_v13, %v227_v12  ;;  %v1163_v18 = vld [vmem:[%s2112_s6 + $0x40] sm:$0xff]  ;;  %v1495_v23 = vpack.c.bf16 %v1166_v22, %v1165_v20  ;;  %v1169_v36 = vld [vmem:[%s2112_s6 + $0x70] sm:$0xff]  ;;  %v1170_v37 = vld [vmem:[%s2112_s6 + $0x78] sm:$0xff] }
  0x1b   :  { %1481 = vmatpush3.bf16.msra.mxu0 %v1480_v7  ;;  %v1492_v21 = vpack.c.bf16 %v1164_v19, %v1163_v18  ;;  %v1167_v24 = vld [vmem:[%s2112_s6 + $0x60] sm:$0xff]  ;;  %v1501_v38 = vpack.c.bf16 %v1170_v37, %v1169_v36  ;;  %v409_v40 = vld [vmem:[%s2114_s8 + $0x8] sm:$0xff]  ;;  %v410_v42 = vld [vmem:[%s2114_s8 + $0x10] sm:$0xff] }
  0x1c   :  { %1482 = vmatprep.subr.bf16.mxu0 %v1668_v10  ;;  %v1498_v26 = vpack.c.bf16 %v1168_v25, %v1167_v24  ;;  %v1160_v29 = vld [vmem:[%s2111_s5] ss:$0 sm:$0xff]  ;;  %v411_v43 = vld [vmem:[%s2114_s8 + $0x18] sm:$0xff]  ;;  %v413_v46 = vld [vmem:[%s2114_s8 + $0x28] sm:$0xff] }
  0x1d   :  { %1493 = vmatpush3.bf16.msra.mxu1 %v1492_v21  ;;  %v408_v39 = vld [vmem:[%s2114_s8] sm:$0xff]  ;;  %v1507_v44 = vpack.c.bf16 %v411_v43, %v410_v42  ;;  %v498_v51 = vld [vmem:[%s2116_s10 + $0x8] sm:$0xff]  ;;  %v499_v56 = vld [vmem:[%s2116_s10 + $0x10] sm:$0xff] }
  0x1e   :  { %1494 = vmatprep.subr.bf16.mxu1 %v1668_v10  ;;  %v1504_v41 = vpack.c.bf16 %v409_v40, %v408_v39  ;;  %v412_v45 = vld [vmem:[%s2114_s8 + $0x20] sm:$0xff]  ;;  %v500_v57 = vld [vmem:[%s2116_s10 + $0x18] sm:$0xff]  ;;  %v502_v61 = vld [vmem:[%s2116_s10 + $0x28] sm:$0xff] }
  0x1f   :  { %1484 = vmatpush3.bf16.msra.mxu0 %v1483_v11  ;;  %v1510_v47 = vpack.c.bf16 %v413_v46, %v412_v45  ;;  %v1161_v48 = vld [vmem:[%s2113_s7] ss:$0 sm:$0xff]  ;;  %v1519_v59 = vpack.c.bf16 %v500_v57, %v499_v56  ;;  %v414_v63 = vld [vmem:[%s2114_s8 + $0x30] sm:$0xff]  ;;  %v415_v1 = vld [vmem:[%s2114_s8 + $0x38] sm:$0xff] }
  0x20   :  { %1485 = vmatprep.subr.bf16.mxu0 %v1668_v10  ;;  %v497_v50 = vld [vmem:[%s2116_s10] sm:$0xff]  ;;  %v503_v2 = vld [vmem:[%s2116_s10 + $0x30] sm:$0xff]  ;;  %v1513_v5 = vpack.c.bf16 %v415_v1, %v414_v63  ;;  %v504_v6 = vld [vmem:[%s2116_s10 + $0x38] sm:$0xff] }
  0x21   :  { %1496 = vmatpush3.bf16.msra.mxu1 %v1495_v23  ;;  %v1516_v55 = vpack.c.bf16 %v498_v51, %v497_v50  ;;  %v501_v60 = vld [vmem:[%s2116_s10 + $0x20] sm:$0xff]  ;;  %v1525_v7 = vpack.c.bf16 %v504_v6, %v503_v2  ;;  %v593_v15 = vld [vmem:[#allocation2 + $0x8] sm:$0xff]  ;;  %v1189_v42 = vld [vmem:[%s2112_s6 + $0xb0] sm:$0xff] }
  0x22   :  { %1497 = vmatprep.subr.bf16.mxu1 %v1668_v10  ;;  %v1522_v62 = vpack.c.bf16 %v502_v61, %v501_v60  ;;  %v1172_v8 = vld [vmem:[%s2113_s7 + $0x1] ss:$0 sm:$0xff]  ;;  %v1178_v16 = vld [vmem:[%s2109_s3 + $0x8] sm:$0xff]  ;;  %v1190_v43 = vld [vmem:[%s2112_s6 + $0xb8] sm:$0xff] }
  0x23   :  { %1487 = vmatpush3.bf16.msra.mxu0 %v1486_v14  ;;  %v61_v25 = vld [vmem:[%s2107_s1] sm:$0x3]  ;;  %v1195_v46 = vld [vmem:[%s2112_s6 + $0xc8] sm:$0xff]  ;;  %v1200_v61 = vld [vmem:[%s2112_s6 + $0xf0] sm:$0xff]  ;;  %s1141_s1 = sshll.u32 %s1670_s0, 4  ;;  %s1142_s1 = int_to_ptr.vmem [resolvable:$true] %s1141_s1 }
  0x24   :  { %1488 = vmatprep.subr.bf16.mxu0 %v1668_v10  ;;  %v1187_v37 = vld [vmem:[%s2112_s6 + $0xa0] sm:$0xff]  ;;  %v1206_v2 = vld [vmem:[%s2114_s8 + $0x48] sm:$0xff]  ;;  %v1207_v6 = vld [vmem:[%s2114_s8 + $0x50] sm:$0xff] }
  0x25   :  { %1499 = vmatpush3.bf16.msra.mxu1 %v1498_v26  ;;  %v1176_v26 = vld [vmem:[%s2117_s11] ss:$0 sm:$0xff] }
  0x26   :  { %1500 = vmatprep.subr.bf16.mxu1 %v1668_v10  ;;  %v1194_v45 = vld [vmem:[%s2112_s6 + $0xc0] sm:$0xff] }
  0x27   :  { %1490 = vmatpush3.bf16.msra.mxu0 %v1489_v17  ;;  %v1174_v17 = vld [vmem:[%s2115_s9] ss:$0 sm:$0xff] }
  0x28   :  { %1503 = vmatprep.subr.bf16.mxu0 %v1668_v10  ;;  %v1198_v51 = vld [vmem:[%s2112_s6 + $0xe0] sm:$0xff] }
  0x29   :  { %1502 = vmatpush3.bf16.msra.mxu1 %v1501_v38  ;;  %v1188_v38 = vld [vmem:[%s2112_s6 + $0xa8] sm:$0xff]  ;;  %v1205_v1 = vld [vmem:[%s2114_s8 + $0x40] sm:$0xff] }
  0x2a   :  { %1515 = vmatprep.subr.bf16.mxu1 %v1668_v10  ;;  %v1534_v40 = vpack.c.bf16 %v1188_v38, %v1187_v37  ;;  %v1214_v37 = vld [vmem:[%s2115_s9 + $0x1] ss:$0 sm:$0xff]  ;;  %s1669_s9 = smov [#allocation5]  }
  0x2b   :  { %s1131_s20 = sshll.u32 %s1669_s9, 4  ;;  %s1132_s20 = int_to_ptr.vmem [resolvable:$true] %s1131_s20 }
  0x2c   :  { %s1613_s21 = scalar_lea.vmem %s1132_s20, 32  ;;  %p1618_p9 = scmp.lt.s32.totalorder %s1132_s20, %s1132_s20 }
  0x2d   :  { %p1614_p8 = scmp.ne.s32.totalorder %s1132_s20, %s1613_s21  ;;  %p1619_p10 = scmp.lt.s32.totalorder %s1613_s21, %s1613_s21 }
  0x2f   :  { %p1620_p11 = por %p1619_p10, %p1618_p9 }
  0x31   :  { %p1621_p12 = pnand %p1620_p11, %p1614_p8 }
  0xeb   :  { %v135_v27 = vpop.f32.mrb[0].mxu0  ;;  %v208_v28 = vpop.f32.mrb[0].mxu1 }
  0xec   :  { %v209_v30 = vadd.f32 %v208_v28, %v135_v27  ;;  %v1311_v31 = vpop.f32.mrb[1].mxu0  ;;  %v1316_v32 = vpop.f32.mrb[1].mxu1 }
  0xed   :  { %v1184_v31 = vld [vmem:[%s2112_s6 + $0x88] sm:$0xff]  ;;  %v1185_v32 = vld [vmem:[%s2112_s6 + $0x90] sm:$0xff] }
  0xee   :  { %v219_v33 = vadd.f32 %v1160_v29, %v209_v30  ;;  %v1183_v30 = vld [vmem:[%s2112_s6 + $0x80] sm:$0xff] }
  0xf0   :  { %vm220_vm2 = vcmp.ge.f32.partialorder %v219_v33, 0.0  ;;  %v221_v34 = vmul.f32 0.01, %v219_v33 }
  0xf2   :  { %v222_v35 = vsel %vm220_vm2, %v219_v33, %v221_v34  ;;  %v1528_v34 = vpack.c.bf16 %v1184_v31, %v1183_v30  ;;  %v1223_v30 = vld [vmem:[%s2116_s10 + $0x78] sm:$0xff] }
  0xf3   :  { %1334 = vmatmul.mubr.msk.f32.vlgmr.msra.gmra.mrb[2].mxu0 %vm238_vm3, %v222_v35  ;;  %v1186_v35 = vld [vmem:[%s2112_s6 + $0x98] sm:$0xff] }
  0xf4   :  { %1371 = vmatprep.mubr.msk.f32.mxu0 %vm1667_vm0, %v1666_v0  ;;  %1505 = vmatpush3.bf16.msra.mxu0 %v1504_v41  ;;  %v1531_v36 = vpack.c.bf16 %v1186_v35, %v1185_v32 }
  0xf5   :  { %1506 = vmatprep.subr.bf16.mxu0 %v1668_v10 }
  0xf8   :  { %1508 = vmatpush3.bf16.msra.mxu0 %v1507_v44  ;;  %v1537_v44 = vpack.c.bf16 %v1190_v43, %v1189_v42 }
  0xf9   :  { %1509 = vmatprep.subr.bf16.mxu0 %v1668_v10 }
  0xfc   :  { %1511 = vmatpush3.bf16.msra.mxu0 %v1510_v47  ;;  %v1196_v47 = vld [vmem:[%s2112_s6 + $0xd0] sm:$0xff] }
  0xfd   :  { %1512 = vmatprep.subr.bf16.mxu0 %v1668_v10 }
 0x100   :  { %1514 = vmatpush3.bf16.msra.mxu0 %v1513_v5  ;;  %v1552_v5 = vpack.c.bf16 %v1206_v2, %v1205_v1 }
 0x101   :  { %1393 = vmatprep.subr.mxu0 %v1666_v0 }
 0x1c6   :  { %v308_v49 = vpop.f32.mrb[2].mxu0 }
 0x1c7   :  { %v309_v52 = vadd.f32 %v1161_v48, %v308_v49  ;;  %v1335_v53 = vpop.f32.mrb[3].mxu0  ;;  %v1540_v48 = vpack.c.bf16 %v1195_v46, %v1194_v45  ;;  %v1197_v49 = vld [vmem:[%s2112_s6 + $0xd8] sm:$0xff]  ;;  %v1225_v46 = vld [vmem:[%s2117_s11 + $0x1] ss:$0 sm:$0xff] }
 0x1c8   :  { %v1543_v50 = vpack.c.bf16 %v1197_v49, %v1196_v47 }
 0x1c9   :  { %vm312_vm4 = vcmp.ge.f32.partialorder %v309_v52, 0.0  ;;  %v313_v54 = vmul.f32 0.01, %v309_v52 }
 0x1cb   :  { %v314_v58 = vsel %vm312_vm4, %v309_v52, %v313_v54  ;;  %v1199_v52 = vld [vmem:[%s2112_s6 + $0xe8] sm:$0xff] }
 0x1cc   :  { %1353 = vmatmul.mubr.msk.f32.vlgmr.msra.gmra.mrb[2].mxu1 %vm238_vm3, %v314_v58  ;;  %v1546_v53 = vpack.c.bf16 %v1199_v52, %v1198_v51 }
 0x1cd   :  { %1517 = vmatpush3.bf16.msra.mxu1 %v1516_v55  ;;  %1390 = vmatprep.mubr.msk.f32.mxu1 %vm1667_vm0, %v1666_v0  ;;  %v1182_v55 = vld [vmem:[%s2111_s5 + $0x1] ss:$0 sm:$0xff] }
 0x1ce   :  { %1518 = vmatprep.subr.bf16.mxu1 %v1668_v10 }
 0x1d1   :  { %1520 = vmatpush3.bf16.msra.mxu1 %v1519_v59 }
 0x1d2   :  { %1521 = vmatprep.subr.bf16.mxu1 %v1668_v10 }
 0x1d5   :  { %1523 = vmatpush3.bf16.msra.mxu1 %v1522_v62  ;;  %v1201_v62 = vld [vmem:[%s2112_s6 + $0xf8] sm:$0xff] }
 0x1d6   :  { %1524 = vmatprep.subr.bf16.mxu1 %v1668_v10  ;;  %v1549_v63 = vpack.c.bf16 %v1201_v62, %v1200_v61 }
 0x1d9   :  { %1526 = vmatpush3.bf16.msra.mxu1 %v1525_v7  ;;  %v1208_v7 = vld [vmem:[%s2114_s8 + $0x58] sm:$0xff] }
 0x1da   :  { %1398 = vmatprep.subr.mxu1 %v1666_v0 }
 0x29f   :  { %v401_v9 = vpop.f32.mrb[2].mxu1 }
 0x2a0   :  { %v402_v11 = vadd.f32 %v1172_v8, %v401_v9  ;;  %v1354_v12 = vpop.f32.mrb[3].mxu1  ;;  %v1555_v8 = vpack.c.bf16 %v1208_v7, %v1207_v6  ;;  %v1209_v9 = vld [vmem:[%s2114_s8 + $0x60] sm:$0xff] }
 0x2a2   :  { %vm405_vm5 = vcmp.ge.f32.partialorder %v402_v11, 0.0  ;;  %v406_v13 = vmul.f32 0.01, %v402_v11 }
 0x2a4   :  { %v407_v14 = vsel %vm405_vm5, %v402_v11, %v406_v13  ;;  %v1210_v11 = vld [vmem:[%s2114_s8 + $0x68] sm:$0xff]  ;;  %v1192_v13 = vld [vmem:[%s2113_s7 + $0x2] ss:$0 sm:$0xff] }
 0x2a5   :  { %1372 = vmatmul.mubr.msk.f32.vlgmr.msra.gmra.mrb[4].mxu0 %vm238_vm3, %v407_v14  ;;  %1391 = vmatmul.mubr.msk.f32.vlgmr.msra.gmra.mrb[4].mxu1 %vm238_vm3, %v407_v14  ;;  %v1558_v12 = vpack.c.bf16 %v1210_v11, %v1209_v9 }
 0x2a6   :  { %1395 = vmatprep.mubr.msk.f32.mxu0 %vm1667_vm0, %v1666_v0  ;;  %1400 = vmatprep.mubr.msk.f32.mxu1 %vm1667_vm0, %v1666_v0 }
 0x2a7   :  { %1394 = vmatpush3.msra.mxu0 %v593_v15  ;;  %1399 = vmatpush3.msra.mxu1 %v1178_v16  ;;  %v1216_v15 = vld [vmem:[%s2116_s10 + $0x40] sm:$0xff]  ;;  %v1217_v16 = vld [vmem:[%s2116_s10 + $0x48] sm:$0xff] }
 0x2a8   :  { %1527 = vmatprep.subr.bf16.mxu0 %v1668_v10  ;;  %1539 = vmatprep.subr.bf16.mxu1 %v1668_v10 }
 0x2a9   :  { %1396 = vmatmul.mubr.msk.f32.vlgmr.msra.gmra.mrb[6].mxu0 %vm65_vm1, %v1770_v3 }
 0x2aa   :  { %1419 = vmatprep.mubr.msk.f32.mxu0 %vm1667_vm0, %v1666_v0  ;;  %1529 = vmatpush3.bf16.msra.mxu0 %v1528_v34 }
 0x2ab   :  { %1530 = vmatprep.subr.bf16.mxu0 %v1668_v10 }
 0x2ae   :  { %1532 = vmatpush3.bf16.msra.mxu0 %v1531_v36 }
 0x2af   :  { %1533 = vmatprep.subr.bf16.mxu0 %v1668_v10 }
 0x2b2   :  { %1535 = vmatpush3.bf16.msra.mxu0 %v1534_v40 }
 0x2b3   :  { %1536 = vmatprep.subr.bf16.mxu0 %v1668_v10 }
 0x2b6   :  { %1538 = vmatpush3.bf16.msra.mxu0 %v1537_v44 }
 0x2b7   :  { %1551 = vmatprep.subr.bf16.mxu0 %v1668_v10 }
 0x378   :  { %v492_v18 = vpop.f32.mrb[4].mxu0  ;;  %v578_v19 = vpop.f32.mrb[4].mxu1 }
 0x379   :  { %v493_v20 = vadd.f32 %v1174_v17, %v492_v18  ;;  %v1373_v21 = vpop.f32.mrb[5].mxu0  ;;  %v1392_v22 = vpop.f32.mrb[5].mxu1  ;;  %v579_v28 = vadd.f32 %v1176_v26, %v578_v19 }
 0x37a   :  { %v1218_v21 = vld [vmem:[%s2116_s10 + $0x50] sm:$0xff]  ;;  %v1219_v22 = vld [vmem:[%s2116_s10 + $0x58] sm:$0xff] }
 0x37b   :  { %1583 = vtanh.f32 %v493_v20  ;;  %v1564_v20 = vpack.c.bf16 %v1217_v16, %v1216_v15 }
 0x37c   :  { %v660_v39 = vpop.f32.mrb[6].mxu0 }
 0x37d   :  { %v1397_v41 = vpop.f32.mrb[7].mxu0 }
 0x385   :  { %v1584_v23 = vpop.eup %1583 }
 0x386   :  { %v582_v3 = vmul.f32 1.442695, %v1584_v23  ;;  %v587_v24 = vsel %vm586_vm6, %v1584_v23, 0.0 }
 0x387   :  { %588 = vadd.xlane.f32.xlu0 %v587_v24  ;;  %v1220_v24 = vld [vmem:[%s2116_s10 + $0x60] sm:$0xff] }
 0x388   :  { %1585 = vpow2.f32 %v582_v3  ;;  %v1567_v3 = vpack.c.bf16 %v1219_v22, %v1218_v21 }
 0x392   :  { %v1586_v27 = vpop.eup %1585 }
 0x393   :  { %v584_v29 = vmul.f32 %v1586_v27, %v61_v25  ;;  %v1221_v25 = vld [vmem:[%s2116_s10 + $0x68] sm:$0xff]  ;;  %v1212_v27 = vld [vmem:[%s2114_s8 + $0x78] sm:$0xff] }
 0x394   :  { %v1570_v26 = vpack.c.bf16 %v1221_v25, %v1220_v24 }
 0x395   :  { %v585_v33 = vadd.f32 %v584_v29, %v579_v28  ;;  %v1222_v28 = vld [vmem:[%s2116_s10 + $0x70] sm:$0xff] }
 0x396   :  { %v1573_v31 = vpack.c.bf16 %v1223_v30, %v1222_v28 }
 0x397   :  { %1121 = vst.msk [vmem:[#allocation5] sm:$0x3] %vm586_vm6, %v585_v33  ;;  %1401 = vmatmul.mubr.msk.f32.vlgmr.msra.gmra.mrb[6].mxu1 %vm65_vm1, %v585_v33 }
 0x398   :  { %1438 = vmatprep.mubr.msk.f32.mxu1 %vm1667_vm0, %v1666_v0  ;;  %1541 = vmatpush3.bf16.msra.mxu1 %v1540_v48 }
 0x399   :  { %1542 = vmatprep.subr.bf16.mxu1 %v1668_v10 }
 0x39c   :  { %1544 = vmatpush3.bf16.msra.mxu1 %v1543_v50 }
 0x39d   :  { %1545 = vmatprep.subr.bf16.mxu1 %v1668_v10 }
 0x3a0   :  { %1547 = vmatpush3.bf16.msra.mxu1 %v1546_v53 }
 0x3a1   :  { %1548 = vmatprep.subr.bf16.mxu1 %v1668_v10 }
 0x3a4   :  { %1550 = vmatpush3.bf16.msra.mxu1 %v1549_v63 }
 0x3a5   :  { %1563 = vmatprep.subr.bf16.mxu1 %v1668_v10 }
 0x46a   :  { %v733_v54 = vpop.f32.mrb[6].mxu1 }
 0x46b   :  { %v734_v56 = vadd.f32 %v733_v54, %v660_v39  ;;  %v1402_v57 = vpop.f32.mrb[7].mxu1 }
 0x46d   :  { %v745_v58 = vadd.f32 %v1182_v55, %v734_v56 }
 0x46f   :  { %vm746_vm7 = vcmp.ge.f32.partialorder %v745_v58, 0.0  ;;  %v747_v59 = vmul.f32 0.01, %v745_v58 }
 0x471   :  { %v748_v60 = vsel %vm746_vm7, %v745_v58, %v747_v59 }
 0x472   :  { %1420 = vmatmul.mubr.msk.f32.vlgmr.msra.gmra.mrb[8].mxu0 %vm238_vm3, %v748_v60 }
 0x473   :  { %1457 = vmatprep.mubr.msk.f32.mxu0 %vm1667_vm0, %v1666_v0  ;;  %1553 = vmatpush3.bf16.msra.mxu0 %v1552_v5 }
 0x474   :  { %1554 = vmatprep.subr.bf16.mxu0 %v1668_v10 }
 0x477   :  { %1556 = vmatpush3.bf16.msra.mxu0 %v1555_v8 }
 0x478   :  { %1557 = vmatprep.subr.bf16.mxu0 %v1668_v10 }
 0x47b   :  { %1559 = vmatpush3.bf16.msra.mxu0 %v1558_v12 }
 0x47c   :  { %1560 = vmatprep.subr.bf16.mxu0 %v1668_v10 }
 0x545   :  { %v835_v14 = vpop.f32.mrb[8].mxu0 }
 0x546   :  { %v836_v17 = vadd.f32 %v1192_v13, %v835_v14  ;;  %v1421_v18 = vpop.f32.mrb[9].mxu0 }
 0x548   :  { %vm839_vm8 = vcmp.ge.f32.partialorder %v836_v17, 0.0  ;;  %v840_v19 = vmul.f32 0.01, %v836_v17 }
 0x54a   :  { %v841_v23 = vsel %vm839_vm8, %v836_v17, %v840_v19 }
 0x54b   :  { %1439 = vmatmul.mubr.msk.f32.vlgmr.msra.gmra.mrb[8].mxu1 %vm238_vm3, %v841_v23 }
 0x54c   :  { %1565 = vmatpush3.bf16.msra.mxu1 %v1564_v20  ;;  %1476 = vmatprep.mubr.msk.f32.mxu1 %vm1667_vm0, %v1666_v0  ;;  %v1211_v0 = vld [vmem:[%s2114_s8 + $0x70] sm:$0xff] }
 0x54d   :  { %1566 = vmatprep.subr.bf16.mxu1 %v1668_v10  ;;  %v1561_v29 = vpack.c.bf16 %v1212_v27, %v1211_v0 }
 0x54f   :  { %1562 = vmatpush3.bf16.msra.mxu0 %v1561_v29 }
 0x550   :  { %1568 = vmatpush3.bf16.msra.mxu1 %v1567_v3 }
 0x551   :  { %1569 = vmatprep.subr.bf16.mxu1 %v1668_v10 }
 0x554   :  { %1571 = vmatpush3.bf16.msra.mxu1 %v1570_v26 }
 0x555   :  { %1572 = vmatprep.subr.bf16.mxu1 %v1668_v10  ;;  %v1203_v10 = vld [vmem:[%s2113_s7 + $0x3] ss:$0 sm:$0xff] }
 0x558   :  { %1574 = vmatpush3.bf16.msra.mxu1 %v1573_v31 }
 0x61e   :  { %v928_v32 = vpop.f32.mrb[8].mxu1 }
 0x61f   :  { %v929_v33 = vadd.f32 %v1203_v10, %v928_v32  ;;  %v1440_v34 = vpop.f32.mrb[9].mxu1 }
 0x621   :  { %vm932_vm9 = vcmp.ge.f32.partialorder %v929_v33, 0.0  ;;  %v933_v35 = vmul.f32 0.01, %v929_v33 }
 0x623   :  { %v934_v36 = vsel %vm932_vm9, %v929_v33, %v933_v35 }
 0x624   :  { %1458 = vmatmul.mubr.msk.f32.vlgmr.msra.gmra.mrb[10].mxu0 %vm238_vm3, %v934_v36  ;;  %1477 = vmatmul.mubr.msk.f32.vlgmr.msra.gmra.mrb[10].mxu1 %vm238_vm3, %v934_v36 }
 0x6f7   :  { %v1021_v38 = vpop.f32.mrb[10].mxu0  ;;  %v1109_v39 = vpop.f32.mrb[10].mxu1 }
 0x6f8   :  { %v1022_v40 = vadd.f32 %v1214_v37, %v1021_v38  ;;  %v1459_v41 = vpop.f32.mrb[11].mxu0  ;;  %v1478_v42 = vpop.f32.mrb[11].mxu1  ;;  %v1110_v48 = vadd.f32 %v1225_v46, %v1109_v39 }
 0x6fa   :  { %1587 = vtanh.f32 %v1022_v40 }
 0x704   :  { %v1588_v43 = vpop.eup %1587 }
 0x705   :  { %v1113_v44 = vmul.f32 1.442695, %v1588_v43  ;;  %v1117_v45 = vsel %vm586_vm6, %v1588_v43, 0.0 }
 0x706   :  { %1118 = vadd.xlane.f32.xlu0 %v1117_v45 }
 0x707   :  { %1589 = vpow2.f32 %v1113_v44 }
 0x711   :  { %v1590_v47 = vpop.eup %1589 }
 0x712   :  { %v1115_v49 = vmul.f32 %v1590_v47, %v1775_v4 }
 0x714   :  { %v1116_v50 = vadd.f32 %v1115_v49, %v1110_v48 }
 0x716   :  { %1122 = vst.msk [vmem:[#allocation6] sm:$0x3] %vm586_vm6, %v1116_v50 }
 0x717   :  { %1624 = shalt.err (!%p1621_p12)
}
 0x718   :  { %s1625_s23 = scalar_lea.hbm %s2118_s12, 32 }
 0x719   :  { %p1626_p13 = scmp.ne.s32.totalorder %s2118_s12, %s1625_s23  ;;  %p1629_p0 = scmp.lt.u32.totalorder %s1625_s23, %s2118_s12 }
 0x71b   :  { %p1631_p1 = pnand %p1629_p0, %p1626_p13 }
 0x71d   :  { %1634 = shalt.err (!%p1631_p1)
}
 0x71e   :  { %1134 = dma.vmem_to_hbm [thread:$0]  %s1132_s20, 32, %s2118_s12, [#allocation4]  }
 0x71f   :  { %s1635_s4 = scalar_lea.vmem %s1142_s1, 32  ;;  %p1640_p3 = scmp.lt.s32.totalorder %s1142_s1, %s1142_s1 }
 0x720   :  { %p1636_p2 = scmp.ne.s32.totalorder %s1142_s1, %s1635_s4  ;;  %p1641_p4 = scmp.lt.s32.totalorder %s1635_s4, %s1635_s4 }
 0x722   :  { %p1642_p5 = por %p1641_p4, %p1640_p3 }
 0x724   :  { %p1643_p6 = pnand %p1642_p5, %p1636_p2 }
 0x726   :  { %1646 = shalt.err (!%p1643_p6)
}
 0x727   :  { %s1647_s30 = scalar_lea.hbm %s2119_s13, 32 }
 0x728   :  { %p1648_p7 = scmp.ne.s32.totalorder %s2119_s13, %s1647_s30  ;;  %p1651_p8 = scmp.lt.u32.totalorder %s1647_s30, %s2119_s13 }
 0x72a   :  { %p1653_p9 = pnand %p1651_p8, %p1648_p7 }
 0x72c   :  { %1656 = shalt.err (!%p1653_p9)
}
 0x72d   :  { %1144 = dma.vmem_to_hbm [thread:$0]  %s1142_s1, 32, %s2119_s13, [#allocation7]   ;;  %v589_v4 = vpop.xlane.xlu0 %588  ;;  %vm1123_vm10 = vcmask 1024  }
 0x793   :  { %v1119_v51 = vpop.xlane.xlu0 %1118 }
 0x794   :  { %v1120_v52 = vadd.f32 %v1119_v51, %v589_v4 }
 0x796   :  { %1124 = vst.msk [vmem:[%s2120_s14] sm:$0x3] %vm1123_vm10, %v1120_v52 }
 0x797   :  { %1659 = dma.done.wait [#allocation4], 32  }
 0x798   :  { %1660 = vsyncadd [#allocation4], 4294967264 }
 0x799   :  { %1661 = dma.done.wait [#allocation7], 32  }
 0x79a   :  { %1662 = vsyncadd [#allocation7], 4294967264 }
 0x79b   :  { %1155 = vsyncpa [#allocation3], 1 }
 0x79c   :  { %1156 = vsyncpa [#allocation4], 1 }
 0x79d   :  { %1157 = vsyncpa [#allocation7], 1 }

</bundles_post_ra>
